<compile_context>
chip_gen: v7x
topology: tpu7x:2x2x1
jax: 0.10.0
libtpu: 0.0.40
codegen_flags: <defaults>
</compile_context>

<pallas_src>
import functools

import jax
import jax.numpy as jnp
import numpy as np
from jax import lax
from jax.experimental import pallas as pl
from jax.experimental.pallas import tpu as pltpu


_VMEM_LIMIT = 48 * 1024 * 1024          # < v7x's 64 MiB physical VMEM, with headroom
_BLOCK_TARGET_BYTES = 4 * 1024 * 1024   # per x block (Pallas double-buffers it)
_BN_CAP = 8                             # max batch elements per grid step (unroll bound)


def _choose_tiles(n, c, hw, itemsize,
                  block_target=_BLOCK_TARGET_BYTES, bn_cap=_BN_CAP):
    """Pick (bn, thw, n_hw): ~block_target-byte lane-aligned x blocks."""
    row_bytes = c * itemsize
    max_thw = max(128, block_target // row_bytes)
    if hw <= max_thw:
        thw = hw
    else:
        thw = 0
        t = (max_thw // 128) * 128
        while t >= 128:
            if hw % t == 0:
                thw = t
                break
            t -= 128
        if thw == 0:
            # No 128-multiple divisor of HW (e.g. 56*56): fixed tile + masked tail.
            thw = max(128, (max_thw // 128) * 128)
    n_hw = -(-hw // thw)
    bn = 1
    for d in range(1, min(n, bn_cap) + 1):
        if n % d == 0 and d * c * thw * itemsize <= block_target:
            bn = d
    return bn, thw, n_hw


def _stats_kernel(shift_ref, x_ref, gram_ref, sum_ref, *, bn, thw, hw, mask_tail):
    # shift_ref: [C, 1] running-mean shift in x's dtype.
    # x_ref:     [BN, C, THW] raw input block (NCHW layout, native dtype).
    # gram_ref:  [C, C] f32 partial Gram of (x - shift) for this batch block.
    # sum_ref:   [C, 1] f32 partial channel sum of (x - shift).
    t = pl.program_id(1)

    @pl.when(t == 0)
    def _init():
        gram_ref[...] = jnp.zeros_like(gram_ref)
        sum_ref[...] = jnp.zeros_like(sum_ref)

    s = shift_ref[...]
    for i in range(bn):                       # short, statically unrolled
        xs = x_ref[i] - s
        if mask_tail:
            lane = lax.broadcasted_iota(jnp.int32, xs.shape, 1)
            xs = jnp.where(lane < (hw - t * thw), xs, jnp.zeros_like(xs))
        # Contract the lane (spatial) axis of both operands: native-dtype MXU matmul
        # with f32 accumulation, C-wide output, no materialized f32 copy of the tile.
        # TODO(synk): confirm via bundle dump that Mosaic lowers this without a
        # per-tile XLU transpose of the RHS; restructure if a vxpose shows up.
        gram_ref[...] += lax.dot_general(
            xs, xs, (((1,), (1,)), ((), ())), preferred_element_type=jnp.float32)
        sum_ref[...] += jnp.sum(xs, axis=1, keepdims=True, dtype=jnp.float32)


def _whiten_kernel(w_ref, b_ref, x_ref, o_ref, *, bn):
    # w_ref: [C, C] block-diagonal whitening matrix (affine scale folded), x's dtype.
    # b_ref: [C, 1] f32 bias with centering folded in.
    # x_ref: [BN, C, THW] raw input block; o_ref same shape/dtype as the network.
    w = w_ref[...]
    b = b_ref[...]
    for i in range(bn):
        xr = jnp.dot(w, x_ref[i], preferred_element_type=jnp.float32)
        o_ref[i] = (xr + b).astype(o_ref.dtype)


def _inv_sqrt_newton_schulz(a, iters=10):
    """Batched symmetric inverse matrix square root of PSD (G, L, L) blocks.

    Matmul-only coupled Newton-Schulz iteration (avoids the serial eigh custom call).
    10 iterations reach f32 accuracy for eps-floored, Frobenius-normalized blocks.
    """
    l = a.shape[-1]
    eye = jnp.eye(l, dtype=a.dtype)
    fro = jnp.sqrt(jnp.sum(a * a, axis=(-2, -1), keepdims=True))
    y = a / fro
    z = jnp.broadcast_to(eye, a.shape)

    def body(_, carry):
        y, z = carry
        t = 0.5 * (3.0 * eye - jnp.matmul(z, y))
        return jnp.matmul(y, t), jnp.matmul(t, z)

    _, z = lax.fori_loop(0, iters, body, (y, z))
    return z / jnp.sqrt(fro)  # ≈ a^{-1/2}


def zca_norm_pi_v2_clip_train(x, weight, bias, running_mean, running_subspaces,
                              *, groups, eps=0.01, momentum=0.1, ns_iters=10):
    N, C, H, W = x.shape
    G = groups
    assert C % G == 0
    L = C // G
    HW = H * W
    M = N * HW
    itemsize = jnp.dtype(x.dtype).itemsize
    bn, thw, n_hw = _choose_tiles(N, C, HW, itemsize)
    nb = N // bn
    mask_tail = (HW % thw) != 0

    xf = x.reshape(N, C, HW)                 # free reshape, native dtype, no HBM pass

    # Shift by the running mean inside the stats kernel (same-dtype subtraction):
    # cov = E[(x-s)(x-s)^T] - d d^T with d = mean(x-s) is exact for any constant s and
    # far better conditioned than a raw one-pass Gram once running_mean tracks mu.
    shift = running_mean.astype(x.dtype)
    shift_f32 = shift.astype(jnp.float32)

    # ---------- kernel 1: partial Gram + channel sums (single read of x) ----------
    stats_cost = pl.CostEstimate(
        flops=2 * M * C * C + 2 * M * C,
        transcendentals=0,
        bytes_accessed=N * C * HW * itemsize + nb * (C * C + C) * 4 + C * itemsize)

    gram_p, sum_p = pl.pallas_call(
        functools.partial(_stats_kernel, bn=bn, thw=thw, hw=HW, mask_tail=mask_tail),
        out_shape=(jax.ShapeDtypeStruct((nb, C, C), jnp.float32),
                   jax.ShapeDtypeStruct((nb, C, 1), jnp.float32)),
        grid_spec=pltpu.PrefetchScalarGridSpec(
            num_scalar_prefetch=0,
            grid=(nb, n_hw),                       # reduction axis last
            in_specs=[pl.BlockSpec((C, 1), lambda n, t: (0, 0)),
                      pl.BlockSpec((bn, C, thw), lambda n, t: (n, 0, t))],
            out_specs=(pl.BlockSpec((None, C, C), lambda n, t: (n, 0, 0)),
                       pl.BlockSpec((None, C, 1), lambda n, t: (n, 0, 0)))),
        compiler_params=pltpu.CompilerParams(
            dimension_semantics=("parallel", "arbitrary"),  # batch axis shards across TCs (v7x)
            vmem_limit_bytes=_VMEM_LIMIT),
        cost_estimate=stats_cost,
    )(shift, xf)

    # ---------- tiny per-group linear algebra (glue, plain JAX, stays in one jit) ----------
    gram = jnp.sum(gram_p, axis=0)                       # (C, C)
    d = jnp.sum(sum_p, axis=0) / M                       # mean of (x - shift), (C, 1)
    mu = d + shift_f32                                   # true channel mean

    cov_full = gram / M - d @ d.T                        # shifted one-pass covariance
    covs = cov_full.reshape(G, L, G, L)[jnp.arange(G), :, jnp.arange(G), :]
    covs = covs + eps * jnp.eye(L, dtype=jnp.float32)    # (G, L, L)

    # TODO(synk): svdv2clip is a custom autograd Function (power-iteration eig with a
    # clipped backward); only its forward (symmetric inverse square root) is reproduced
    # here via a matmul-only Newton-Schulz iteration — the clipped gradient is not.
    subspaces = _inv_sqrt_newton_schulz(covs, iters=ns_iters)   # (G, L, L)

    # Fold centering + affine into one block-diagonal matrix and a bias vector:
    #   weight*(S@(x-mu)) + bias = (weight*S) @ x + (bias - weight*(S@mu))
    # TODO(synk): for large C (>=256, L>=128) switch to per-group (G,L,L) Gram and
    # per-group whitening to exploit the block-diagonal sparsity; dense is better MXU
    # fill for small L.
    bd = jnp.zeros((G, L, G, L), jnp.float32)
    bd = bd.at[jnp.arange(G), :, jnp.arange(G), :].set(subspaces)
    sub_bd = bd.reshape(C, C)
    w = weight.astype(jnp.float32)
    b = bias.astype(jnp.float32)
    w_eff = (w * sub_bd).astype(x.dtype)                 # MXU-native dtype (bf16 nets)
    b_eff = b - w * (sub_bd @ mu)                        # keep f32 for the add

    # ---------- kernel 2: whiten + affine, straight back to NCHW in network dtype ----------
    whiten_cost = pl.CostEstimate(
        flops=2 * M * C * C,
        transcendentals=0,
        bytes_accessed=2 * N * C * HW * itemsize + C * C * itemsize + C * 4)

    out = pl.pallas_call(
        functools.partial(_whiten_kernel, bn=bn),
        out_shape=jax.ShapeDtypeStruct((N, C, HW), x.dtype),
        grid_spec=pltpu.PrefetchScalarGridSpec(
            num_scalar_prefetch=0,
            grid=(nb, n_hw),
            in_specs=[pl.BlockSpec((C, C), lambda n, t: (0, 0)),
                      pl.BlockSpec((C, 1), lambda n, t: (0, 0)),
                      pl.BlockSpec((bn, C, thw), lambda n, t: (n, 0, t))],
            out_specs=pl.BlockSpec((bn, C, thw), lambda n, t: (n, 0, t))),
        compiler_params=pltpu.CompilerParams(
            dimension_semantics=("parallel", "parallel"),
            vmem_limit_bytes=_VMEM_LIMIT),
        cost_estimate=whiten_cost,
    )(w_eff, b_eff, xf)

    y = out.reshape(N, C, H, W)                          # free reshape back to NCHW

    # running-stat EMA updates (the torch.no_grad() buffer updates), returned functionally.
    new_running_mean = (1.0 - momentum) * running_mean + momentum * mu
    new_running_subspaces = (1.0 - momentum) * running_subspaces + momentum * subspaces
    return y, new_running_mean, new_running_subspaces


def _reference(x, weight, bias, *, groups, eps):
    # Pure-JAX reference mirroring the PyTorch training forward (two-pass cov + eigh).
    N, C, H, W = x.shape
    G = groups
    L = C // G
    M = N * H * W
    x2 = jnp.transpose(x, (1, 0, 2, 3)).reshape(C, M)
    mu = jnp.mean(x2, axis=1, keepdims=True)
    xc = x2 - mu
    xxt = xc @ xc.T / M + eps * jnp.eye(C)
    outs = []
    for g in range(G):
        covg = xxt[g * L:(g + 1) * L, g * L:(g + 1) * L]
        e, v = jnp.linalg.eigh(covg)
        sub = v @ jnp.diag(jax.lax.rsqrt(e)) @ v.T
        outs.append(sub @ xc[g * L:(g + 1) * L])
    xr = jnp.concatenate(outs, axis=0) * weight + bias
    return xr.reshape(C, N, H, W).transpose(1, 0, 2, 3)


if __name__ == "__main__":
    key = jax.random.PRNGKey(0)
    kx, kw = jax.random.split(key)

    # small shapes consistent with the module: num_features=32, groups=4 → L=8
    N, C, H, W = 2, 32, 8, 8
    G = 4
    L = C // G

    x = jax.random.normal(kx, (N, C, H, W), dtype=jnp.float32)

    # deterministic parameter init matching reset_parameters():
    #   weight.uniform_(), bias.zero_(), running_mean.zero_(), running_subspace_i = I
    weight = jax.random.uniform(kw, (C, 1), dtype=jnp.float32)
    bias = jnp.zeros((C, 1), jnp.float32)
    running_mean = jnp.zeros((C, 1), jnp.float32)
    running_subspaces = jnp.tile(jnp.eye(L, dtype=jnp.float32)[None], (G, 1, 1))

    fwd = jax.jit(functools.partial(zca_norm_pi_v2_clip_train,
                                    groups=G, eps=0.01, momentum=0.1))
    y, new_rm, new_rs = fwd(x, weight, bias, running_mean, running_subspaces)
    y = jax.block_until_ready(y)

    y_ref = _reference(x, weight, bias, groups=G, eps=0.01)
    np.testing.assert_allclose(np.asarray(y), np.asarray(y_ref), rtol=2e-3, atol=2e-3)
    assert y.shape == (N, C, H, W)
    assert new_rm.shape == (C, 1) and new_rs.shape == (G, L, L)

    print("KERNEL_OK")
</pallas_src>

<mosaic_0001>
module attributes {stable_mosaic.version = 11 : i64} {
  func.func @_stats_kernel(%arg0: i32, %arg1: i32, %arg2: memref<32x1xf32, #tpu.memory_space<vmem>>, %arg3: memref<2x32x64xf32, #tpu.memory_space<vmem>>, %arg4: memref<1x32x32xf32, #tpu.memory_space<vmem>>, %arg5: memref<1x32x1xf32, #tpu.memory_space<vmem>>) attributes {dimension_semantics = [#tpu.dimension_semantics<parallel>, #tpu.dimension_semantics<arbitrary>], iteration_bounds = array<i64: 1, 1>, scalar_prefetch = 0 : i64, scratch_operands = 0 : i64, tpu.core_type = #tpu.core_type<tc>, window_params = [{pipeline_mode = #tpu.pipeline_mode<synchronous>, transform_indices = @transform_0, window_bounds = array<i64: 32, 1>}, {transform_indices = @transform_1, window_bounds = array<i64: 2, 32, 64>}, {transform_indices = @transform_2, window_bounds = array<i64: 1, 32, 32>}, {transform_indices = @transform_3, window_bounds = array<i64: 1, 32, 1>}]} {
    %c0_i32 = arith.constant 0 : i32
    %0 = arith.cmpi eq, %arg1, %c0_i32 : i32
    %1 = arith.extui %0 : i1 to i32
    %c0_i32_0 = arith.constant 0 : i32
    %2 = arith.cmpi ne, %1, %c0_i32_0 : i32
    scf.if %2 {
      %cst_34 = arith.constant 0.000000e+00 : f32
      %42 = vector.broadcast %cst_34 : f32 to vector<32x32xf32>
      %c0_35 = arith.constant 0 : index
      %c0_36 = arith.constant 0 : index
      %c0_37 = arith.constant 0 : index
      %43 = vector.load %arg4[%c0_35, %c0_36, %c0_37] : memref<1x32x32xf32, #tpu.memory_space<vmem>>, vector<1x32x32xf32>
      %44 = vector.shape_cast %43 : vector<1x32x32xf32> to vector<32x32xf32>
      %45 = vector.shape_cast %42 : vector<32x32xf32> to vector<1x32x32xf32>
      tpu.vector_store %arg4[%c0_35, %c0_36, %c0_37], %45 {strides = array<i32>} : memref<1x32x32xf32, #tpu.memory_space<vmem>>, vector<1x32x32xf32>,
      %cst_38 = arith.constant 0.000000e+00 : f32
      %46 = vector.broadcast %cst_38 : f32 to vector<32x1xf32>
      %c0_39 = arith.constant 0 : index
      %c0_40 = arith.constant 0 : index
      %c0_41 = arith.constant 0 : index
      %47 = vector.load %arg5[%c0_39, %c0_40, %c0_41] : memref<1x32x1xf32, #tpu.memory_space<vmem>>, vector<1x32x1xf32>
      %48 = vector.shape_cast %47 : vector<1x32x1xf32> to vector<32x1xf32>
      %49 = vector.shape_cast %46 : vector<32x1xf32> to vector<1x32x1xf32>
      tpu.vector_store %arg5[%c0_39, %c0_40, %c0_41], %49 {strides = array<i32>} : memref<1x32x1xf32, #tpu.memory_space<vmem>>, vector<1x32x1xf32>,
    } else {
    }
    %c0 = arith.constant 0 : index
    %c0_1 = arith.constant 0 : index
    %3 = vector.load %arg2[%c0, %c0_1] : memref<32x1xf32, #tpu.memory_space<vmem>>, vector<32x1xf32>
    %c0_2 = arith.constant 0 : index
    %c0_3 = arith.constant 0 : index
    %c0_4 = arith.constant 0 : index
    %4 = vector.load %arg3[%c0_2, %c0_3, %c0_4] : memref<2x32x64xf32, #tpu.memory_space<vmem>>, vector<1x32x64xf32>
    %5 = vector.shape_cast %4 : vector<1x32x64xf32> to vector<32x64xf32>
    %6 = vector.broadcast %3 : vector<32x1xf32> to vector<32x64xf32>
    %7 = arith.subf %5, %6 : vector<32x64xf32>
    %c0_5 = arith.constant 0 : index
    %c0_6 = arith.constant 0 : index
    %c0_7 = arith.constant 0 : index
    %8 = vector.load %arg4[%c0_5, %c0_6, %c0_7] : memref<1x32x32xf32, #tpu.memory_space<vmem>>, vector<1x32x32xf32>
    %9 = vector.shape_cast %8 : vector<1x32x32xf32> to vector<32x32xf32>
    %cst = arith.constant dense<0.000000e+00> : vector<32x32xf32>
    %10 = tpu.matmul %7, %7, %cst {dimension_numbers = #tpu.dot_dimension_numbers<[1], [1], [0], [0], [0, 0, 1, 0], [], []>} : vector<32x64xf32>, vector<32x64xf32>, vector<32x32xf32> -> vector<32x32xf32>
    %11 = arith.addf %9, %10 : vector<32x32xf32>
    %c0_8 = arith.constant 0 : index
    %c0_9 = arith.constant 0 : index
    %c0_10 = arith.constant 0 : index
    %12 = vector.load %arg4[%c0_8, %c0_9, %c0_10] : memref<1x32x32xf32, #tpu.memory_space<vmem>>, vector<1x32x32xf32>
    %13 = vector.shape_cast %12 : vector<1x32x32xf32> to vector<32x32xf32>
    %14 = vector.shape_cast %11 : vector<32x32xf32> to vector<1x32x32xf32>
    tpu.vector_store %arg4[%c0_8, %c0_9, %c0_10], %14 {strides = array<i32>} : memref<1x32x32xf32, #tpu.memory_space<vmem>>, vector<1x32x32xf32>,
    %c0_11 = arith.constant 0 : index
    %c0_12 = arith.constant 0 : index
    %c0_13 = arith.constant 0 : index
    %15 = vector.load %arg5[%c0_11, %c0_12, %c0_13] : memref<1x32x1xf32, #tpu.memory_space<vmem>>, vector<1x32x1xf32>
    %16 = vector.shape_cast %15 : vector<1x32x1xf32> to vector<32x1xf32>
    %cst_14 = arith.constant dense<0.000000e+00> : vector<32xf32>
    %17 = vector.multi_reduction <add>, %7, %cst_14 [1] : vector<32x64xf32> to vector<32xf32>
    %18 = vector.shape_cast %17 : vector<32xf32> to vector<32x1xf32>
    %19 = arith.addf %16, %18 : vector<32x1xf32>
    %c0_15 = arith.constant 0 : index
    %c0_16 = arith.constant 0 : index
    %c0_17 = arith.constant 0 : index
    %20 = vector.load %arg5[%c0_15, %c0_16, %c0_17] : memref<1x32x1xf32, #tpu.memory_space<vmem>>, vector<1x32x1xf32>
    %21 = vector.shape_cast %20 : vector<1x32x1xf32> to vector<32x1xf32>
    %22 = vector.shape_cast %19 : vector<32x1xf32> to vector<1x32x1xf32>
    tpu.vector_store %arg5[%c0_15, %c0_16, %c0_17], %22 {strides = array<i32>} : memref<1x32x1xf32, #tpu.memory_space<vmem>>, vector<1x32x1xf32>,
    %c1 = arith.constant 1 : index
    %c0_18 = arith.constant 0 : index
    %c0_19 = arith.constant 0 : index
    %23 = vector.load %arg3[%c1, %c0_18, %c0_19] : memref<2x32x64xf32, #tpu.memory_space<vmem>>, vector<1x32x64xf32>
    %24 = vector.shape_cast %23 : vector<1x32x64xf32> to vector<32x64xf32>
    %25 = vector.broadcast %3 : vector<32x1xf32> to vector<32x64xf32>
    %26 = arith.subf %24, %25 : vector<32x64xf32>
    %c0_20 = arith.constant 0 : index
    %c0_21 = arith.constant 0 : index
    %c0_22 = arith.constant 0 : index
    %27 = vector.load %arg4[%c0_20, %c0_21, %c0_22] : memref<1x32x32xf32, #tpu.memory_space<vmem>>, vector<1x32x32xf32>
    %28 = vector.shape_cast %27 : vector<1x32x32xf32> to vector<32x32xf32>
    %cst_23 = arith.constant dense<0.000000e+00> : vector<32x32xf32>
    %29 = tpu.matmul %26, %26, %cst_23 {dimension_numbers = #tpu.dot_dimension_numbers<[1], [1], [0], [0], [0, 0, 1, 0], [], []>} : vector<32x64xf32>, vector<32x64xf32>, vector<32x32xf32> -> vector<32x32xf32>
    %30 = arith.addf %28, %29 : vector<32x32xf32>
    %c0_24 = arith.constant 0 : index
    %c0_25 = arith.constant 0 : index
    %c0_26 = arith.constant 0 : index
    %31 = vector.load %arg4[%c0_24, %c0_25, %c0_26] : memref<1x32x32xf32, #tpu.memory_space<vmem>>, vector<1x32x32xf32>
    %32 = vector.shape_cast %31 : vector<1x32x32xf32> to vector<32x32xf32>
    %33 = vector.shape_cast %30 : vector<32x32xf32> to vector<1x32x32xf32>
    tpu.vector_store %arg4[%c0_24, %c0_25, %c0_26], %33 {strides = array<i32>} : memref<1x32x32xf32, #tpu.memory_space<vmem>>, vector<1x32x32xf32>,
    %c0_27 = arith.constant 0 : index
    %c0_28 = arith.constant 0 : index
    %c0_29 = arith.constant 0 : index
    %34 = vector.load %arg5[%c0_27, %c0_28, %c0_29] : memref<1x32x1xf32, #tpu.memory_space<vmem>>, vector<1x32x1xf32>
    %35 = vector.shape_cast %34 : vector<1x32x1xf32> to vector<32x1xf32>
    %cst_30 = arith.constant dense<0.000000e+00> : vector<32xf32>
    %36 = vector.multi_reduction <add>, %26, %cst_30 [1] : vector<32x64xf32> to vector<32xf32>
    %37 = vector.shape_cast %36 : vector<32xf32> to vector<32x1xf32>
    %38 = arith.addf %35, %37 : vector<32x1xf32>
    %c0_31 = arith.constant 0 : index
    %c0_32 = arith.constant 0 : index
    %c0_33 = arith.constant 0 : index
    %39 = vector.load %arg5[%c0_31, %c0_32, %c0_33] : memref<1x32x1xf32, #tpu.memory_space<vmem>>, vector<1x32x1xf32>
    %40 = vector.shape_cast %39 : vector<1x32x1xf32> to vector<32x1xf32>
    %41 = vector.shape_cast %38 : vector<32x1xf32> to vector<1x32x1xf32>
    tpu.vector_store %arg5[%c0_31, %c0_32, %c0_33], %41 {strides = array<i32>} : memref<1x32x1xf32, #tpu.memory_space<vmem>>, vector<1x32x1xf32>,
    return
  }
  func.func @transform_0(%arg0: i32, %arg1: i32) -> (i32, i32) {
    %c0_i32 = arith.constant 0 : i32
    %c0_i32_0 = arith.constant 0 : i32
    %c0_i32_1 = arith.constant 0 : i32
    return %c0_i32, %c0_i32_0 : i32, i32
  }
  func.func @transform_1(%arg0: i32, %arg1: i32) -> (i32, i32, i32) {
    %c0_i32 = arith.constant 0 : i32
    %c0_i32_0 = arith.constant 0 : i32
    return %arg0, %c0_i32, %arg1 : i32, i32, i32
  }
  func.func @transform_2(%arg0: i32, %arg1: i32) -> (i32, i32, i32) {
    %c0_i32 = arith.constant 0 : i32
    %c0_i32_0 = arith.constant 0 : i32
    %c0_i32_1 = arith.constant 0 : i32
    return %arg0, %c0_i32, %c0_i32_0 : i32, i32, i32
  }
  func.func @transform_3(%arg0: i32, %arg1: i32) -> (i32, i32, i32) {
    %c0_i32 = arith.constant 0 : i32
    %c0_i32_0 = arith.constant 0 : i32
    %c0_i32_1 = arith.constant 0 : i32
    return %arg0, %c0_i32, %c0_i32_0 : i32, i32, i32
  }
}

module attributes {stable_mosaic.version = 11 : i64} {
  func.func @_whiten_kernel(%arg0: i32, %arg1: i32, %arg2: memref<32x32xf32, #tpu.memory_space<vmem>>, %arg3: memref<32x1xf32, #tpu.memory_space<vmem>>, %arg4: memref<2x32x64xf32, #tpu.memory_space<vmem>>, %arg5: memref<2x32x64xf32, #tpu.memory_space<vmem>>) attributes {dimension_semantics = [#tpu.dimension_semantics<parallel>, #tpu.dimension_semantics<parallel>], iteration_bounds = array<i64: 1, 1>, scalar_prefetch = 0 : i64, scratch_operands = 0 : i64, tpu.core_type = #tpu.core_type<tc>, window_params = [{pipeline_mode = #tpu.pipeline_mode<synchronous>, transform_indices = @transform_0, window_bounds = array<i64: 32, 32>}, {pipeline_mode = #tpu.pipeline_mode<synchronous>, transform_indices = @transform_1, window_bounds = array<i64: 32, 1>}, {transform_indices = @transform_2, window_bounds = array<i64: 2, 32, 64>}, {transform_indices = @transform_3, window_bounds = array<i64: 2, 32, 64>}]} {
    %c0 = arith.constant 0 : index
    %c0_0 = arith.constant 0 : index
    %0 = vector.load %arg2[%c0, %c0_0] : memref<32x32xf32, #tpu.memory_space<vmem>>, vector<32x32xf32>
    %c0_1 = arith.constant 0 : index
    %c0_2 = arith.constant 0 : index
    %1 = vector.load %arg3[%c0_1, %c0_2] : memref<32x1xf32, #tpu.memory_space<vmem>>, vector<32x1xf32>
    %c0_3 = arith.constant 0 : index
    %c0_4 = arith.constant 0 : index
    %c0_5 = arith.constant 0 : index
    %2 = vector.load %arg4[%c0_3, %c0_4, %c0_5] : memref<2x32x64xf32, #tpu.memory_space<vmem>>, vector<1x32x64xf32>
    %3 = vector.shape_cast %2 : vector<1x32x64xf32> to vector<32x64xf32>
    %cst = arith.constant dense<0.000000e+00> : vector<32x64xf32>
    %4 = tpu.matmul %0, %3, %cst {dimension_numbers = #tpu.dot_dimension_numbers<[1], [0], [0], [1], [0, 0, 1, 1], [], []>} : vector<32x32xf32>, vector<32x64xf32>, vector<32x64xf32> -> vector<32x64xf32>
    %5 = vector.broadcast %1 : vector<32x1xf32> to vector<32x64xf32>
    %6 = arith.addf %4, %5 : vector<32x64xf32>
    %c0_6 = arith.constant 0 : index
    %c0_7 = arith.constant 0 : index
    %c0_8 = arith.constant 0 : index
    %7 = vector.load %arg5[%c0_6, %c0_7, %c0_8] : memref<2x32x64xf32, #tpu.memory_space<vmem>>, vector<1x32x64xf32>
    %8 = vector.shape_cast %7 : vector<1x32x64xf32> to vector<32x64xf32>
    %9 = vector.shape_cast %6 : vector<32x64xf32> to vector<1x32x64xf32>
    tpu.vector_store %arg5[%c0_6, %c0_7, %c0_8], %9 {strides = array<i32>} : memref<2x32x64xf32, #tpu.memory_space<vmem>>, vector<1x32x64xf32>,
    %c1 = arith.constant 1 : index
    %c0_9 = arith.constant 0 : index
    %c0_10 = arith.constant 0 : index
    %10 = vector.load %arg4[%c1, %c0_9, %c0_10] : memref<2x32x64xf32, #tpu.memory_space<vmem>>, vector<1x32x64xf32>
    %11 = vector.shape_cast %10 : vector<1x32x64xf32> to vector<32x64xf32>
    %cst_11 = arith.constant dense<0.000000e+00> : vector<32x64xf32>
    %12 = tpu.matmul %0, %11, %cst_11 {dimension_numbers = #tpu.dot_dimension_numbers<[1], [0], [0], [1], [0, 0, 1, 1], [], []>} : vector<32x32xf32>, vector<32x64xf32>, vector<32x64xf32> -> vector<32x64xf32>
    %13 = vector.broadcast %1 : vector<32x1xf32> to vector<32x64xf32>
    %14 = arith.addf %12, %13 : vector<32x64xf32>
    %c1_12 = arith.constant 1 : index
    %c0_13 = arith.constant 0 : index
    %c0_14 = arith.constant 0 : index
    %15 = vector.load %arg5[%c1_12, %c0_13, %c0_14] : memref<2x32x64xf32, #tpu.memory_space<vmem>>, vector<1x32x64xf32>
    %16 = vector.shape_cast %15 : vector<1x32x64xf32> to vector<32x64xf32>
    %17 = vector.shape_cast %14 : vector<32x64xf32> to vector<1x32x64xf32>
    tpu.vector_store %arg5[%c1_12, %c0_13, %c0_14], %17 {strides = array<i32>} : memref<2x32x64xf32, #tpu.memory_space<vmem>>, vector<1x32x64xf32>,
    return
  }
  func.func @transform_0(%arg0: i32, %arg1: i32) -> (i32, i32) {
    %c0_i32 = arith.constant 0 : i32
    %c0_i32_0 = arith.constant 0 : i32
    %c0_i32_1 = arith.constant 0 : i32
    return %c0_i32, %c0_i32_0 : i32, i32
  }
  func.func @transform_1(%arg0: i32, %arg1: i32) -> (i32, i32) {
    %c0_i32 = arith.constant 0 : i32
    %c0_i32_0 = arith.constant 0 : i32
    %c0_i32_1 = arith.constant 0 : i32
    return %c0_i32, %c0_i32_0 : i32, i32
  }
  func.func @transform_2(%arg0: i32, %arg1: i32) -> (i32, i32, i32) {
    %c0_i32 = arith.constant 0 : i32
    %c0_i32_0 = arith.constant 0 : i32
    return %arg0, %c0_i32, %arg1 : i32, i32, i32
  }
  func.func @transform_3(%arg0: i32, %arg1: i32) -> (i32, i32, i32) {
    %c0_i32 = arith.constant 0 : i32
    %c0_i32_0 = arith.constant 0 : i32
    return %arg0, %c0_i32, %arg1 : i32, i32, i32
  }
}

</mosaic_0001>

<bundles_post_ra>
// kernel: mul.35
= control target key start
LH: loop header
LB: loop body
LE: loop exit
PB: predicated region body
PF: predicated region fallthrough
CT: control target
= control target key end

     0   :  { %s34_s0 = inlined_call_operand.vmem [shape: f32[32,1], index: 0, kind: input, shape index: {}]   ;;  %s35_s1 = inlined_call_operand.vmem [shape: f32[32,1], index: 1, kind: input, shape index: {}]   ;;  %s36_s2 = inlined_call_operand.vmem [shape: f32[32,1], index: 2, kind: output, shape index: {}]  }
   0x1   :  { %v3_v0 = vld [vmem:[%s34_s0] sm:$0x1] }
   0x2   :  { %v4_v1 = vld [vmem:[%s35_s1] sm:$0x1] }
   0x3   :  { %v7_v2 = vmul.f32 %v4_v1, %v3_v0 }
   0x5   :  { %9 = vst [vmem:[%s36_s2] sm:$0x1] %v7_v2 }

// kernel: sub.11
= control target key start
LH: loop header
LB: loop body
LE: loop exit
PB: predicated region body
PF: predicated region fallthrough
CT: control target
= control target key end

     0   :  { %s100_s0 = inlined_call_operand.vmem [shape: f32[32,1], index: 0, kind: input, shape index: {}]   ;;  %s101_s1 = inlined_call_operand.vmem [shape: f32[32,1], index: 1, kind: input, shape index: {}]   ;;  %s102_s2 = inlined_call_operand.vmem [shape: f32[32,1], index: 2, kind: output, shape index: {}]  }
   0x1   :  { %v3_v0 = vld [vmem:[%s100_s0] sm:$0xff]  ;;  %v40_v2 = vld [vmem:[%s100_s0 + $0x8] sm:$0xff]  ;;  %v43_v5 = vld [vmem:[%s100_s0 + $0x10] sm:$0xff] }
   0x2   :  { %v4_v1 = vld [vmem:[%s101_s1] sm:$0xff]  ;;  %v41_v4 = vld [vmem:[%s101_s1 + $0x8] sm:$0xff]  ;;  %v44_v6 = vld [vmem:[%s101_s1 + $0x10] sm:$0xff] }
   0x3   :  { %v7_v3 = vsub.f32 %v3_v0, %v4_v1  ;;  %v16_v7 = vsub.f32 %v40_v2, %v41_v4  ;;  %v26_v8 = vsub.f32 %v43_v5, %v44_v6  ;;  %v46_v9 = vld [vmem:[%s100_s0 + $0x18] sm:$0xff] }
   0x4   :  { %v47_v10 = vld [vmem:[%s101_s1 + $0x18] sm:$0xff] }
   0x5   :  { %9 = vst [vmem:[%s102_s2] sm:$0xff] %v7_v3  ;;  %v36_v11 = vsub.f32 %v46_v9, %v47_v10  ;;  %42 = vst [vmem:[%s102_s2 + $0x8] sm:$0xff] %v16_v7 }
   0x6   :  { %45 = vst [vmem:[%s102_s2 + $0x10] sm:$0xff] %v26_v8 }
   0x7   :  { %48 = vst [vmem:[%s102_s2 + $0x18] sm:$0xff] %v36_v11 }

// kernel: zca_norm_pi_v2_clip_train.2
= control target key start
LH: loop header
LB: loop body
LE: loop exit
PB: predicated region body
PF: predicated region fallthrough
CT: control target
= control target key end

     0   :  { %v437_v0 = vmov 0   ;;  %vm22_vm0 = vcmask 7168   ;;  %v438_v5 = vmov 0.0   ;;  %vm63_vm1 = vcmask 523264   ;;  %s685_s0 = inlined_call_operand.vmem [shape: f32[32,1], index: 0, kind: input, shape index: {}]   ;;  %s686_s3 = inlined_call_operand.vmem [shape: f32[1,32,1], index: 3, kind: output, shape index: {1}]   ;;  %s687_s1 = inlined_call_operand.vmem [shape: f32[2,32,64], index: 1, kind: input, shape index: {}]   ;;  %s688_s2 = inlined_call_operand.vmem [shape: f32[1,32,32], index: 2, kind: output, shape index: {0}]  }
   0x1   :  { %435 = vset.pattern.permute.xlu0 %v437_v0  ;;  %v27_v1 = vld [vmem:[%s685_s0] sm:$0xff]  ;;  %436 = vset.pattern.permute.xlu1 %v437_v0  ;;  %v29_v2 = vld [vmem:[%s685_s0 + $0x10] sm:$0xff]  ;;  %v28_v3 = vld [vmem:[%s685_s0 + $0x8] sm:$0xff]  ;;  %23 = vst.msk [vmem:[%s686_s3] sm:$0xff] %vm22_vm0, %v438_v5  ;;  %vm17_vm3 = vcmask 261120  }
   0x2   :  { %37 = vperm.xlu0 %435, %v27_v1   ;;  %47 = vperm.xlu1 %436, %v29_v2   ;;  %v30_v4 = vld [vmem:[%s685_s0 + $0x18] sm:$0xff]  ;;  %24 = vst.msk [vmem:[%s686_s3 + $0x8] sm:$0xff] %vm22_vm0, %v438_v5  ;;  %25 = vst.msk [vmem:[%s686_s3 + $0x10] sm:$0xff] %vm22_vm0, %v438_v5  ;;  %v31_v6 = vld [vmem:[%s687_s1] sm:$0xff] }
   0x3   :  { %26 = vst.msk [vmem:[%s686_s3 + $0x18] sm:$0xff] %vm22_vm0, %v438_v5  ;;  %v353_v7 = vld [vmem:[%s687_s1 + $0x20] sm:$0xff]  ;;  %v33_v8 = vld [vmem:[%s687_s1 + $0x10] sm:$0xff]  ;;  %v32_v15 = vld [vmem:[%s687_s1 + $0x8] sm:$0xff] }
   0x4   :  { %v355_v13 = vld [vmem:[%s687_s1 + $0x30] sm:$0xff]  ;;  %v354_v16 = vld [vmem:[%s687_s1 + $0x28] sm:$0xff]  ;;  %v34_v17 = vld [vmem:[%s687_s1 + $0x18] sm:$0xff]  ;;  %19 = vst.msk [vmem:[%s688_s2 + $0x8] sm:$0xff] %vm17_vm3, %v438_v5 }
   0x5   :  { %v356_v18 = vld [vmem:[%s687_s1 + $0x38] sm:$0xff]  ;;  %vm521_vm2 = vmpackc.low %vm63_vm1, %vm63_vm1  ;;  %18 = vst.msk [vmem:[%s688_s2] sm:$0xff] %vm17_vm3, %v438_v5 }
   0x6   :  { %42 = vperm.xlu0 %435, %v28_v3   ;;  %52 = vperm.xlu1 %436, %v30_v4   ;;  %20 = vst.msk [vmem:[%s688_s2 + $0x10] sm:$0xff] %vm17_vm3, %v438_v5  ;;  %21 = vst.msk [vmem:[%s688_s2 + $0x18] sm:$0xff] %vm17_vm3, %v438_v5 }
   0x8   :  { %v170_v39 = vld [vmem:[%s686_s3] sm:$0xff] }
   0x9   :  { %v171_v42 = vld [vmem:[%s686_s3 + $0x8] sm:$0xff]  ;;  %v172_v43 = vld [vmem:[%s686_s3 + $0x10] sm:$0xff] }
   0xa   :  { %v173_v48 = vld [vmem:[%s686_s3 + $0x18] sm:$0xff] }
   0xb   :  { %v60_v63 = vld [vmem:[%s688_s2 + $0x8] sm:$0xff] }
   0xc   :  { %v59_v0 = vld [vmem:[%s688_s2] sm:$0xff] }
  0x81   :  { %v38_v9 = vpop.permute.xlu0 %37  ;;  %v48_v10 = vpop.permute.xlu1 %47 }
  0x82   :  { %v55_v11 = vsub.f32 %v31_v6, %v38_v9  ;;  %v200_v12 = vsub.f32 %v353_v7, %v38_v9  ;;  %v57_v14 = vsub.f32 %v33_v8, %v48_v10  ;;  %v202_v20 = vsub.f32 %v355_v13, %v48_v10  ;;  %v62_v7 = vld [vmem:[%s688_s2 + $0x18] sm:$0xff]  ;;  %v61_v8 = vld [vmem:[%s688_s2 + $0x10] sm:$0xff] }
  0x84   :  { %389 = vmatprep.mubr.msk.f32.mxu0 %vm63_vm1, %v55_v11  ;;  %403 = vmatprep.mubr.msk.f32.mxu1 %vm63_vm1, %v200_v12  ;;  %v174_v19 = vsel %vm63_vm1, %v55_v11, 0.0  ;;  %v180_v23 = vsel %vm63_vm1, %v57_v14, 0.0  ;;  %v317_v35 = vsel %vm63_vm1, %v200_v12, 0.0  ;;  %v323_v37 = vsel %vm63_vm1, %v202_v20, 0.0 }
  0x85   :  { %175 = vadd.xlane.f32.xlu0 %v174_v19  ;;  %v43_v21 = vpop.permute.xlu0 %42  ;;  %v53_v22 = vpop.permute.xlu1 %52 }
  0x86   :  { %v56_v24 = vsub.f32 %v32_v15, %v43_v21  ;;  %v201_v25 = vsub.f32 %v354_v16, %v43_v21  ;;  %v58_v26 = vsub.f32 %v34_v17, %v53_v22  ;;  %v203_v27 = vsub.f32 %v356_v18, %v53_v22 }
  0x88   :  { %v415_v29 = vpack.c.bf16 %v58_v26, %v57_v14  ;;  %v177_v30 = vsel %vm63_vm1, %v56_v24, 0.0  ;;  %v409_v31 = vpack.c.bf16 %v56_v24, %v55_v11  ;;  %v421_v32 = vpack.c.bf16 %v201_v25, %v200_v12 }
  0x89   :  { %181 = vadd.xlane.f32.xlu0 %v180_v23  ;;  %178 = vadd.xlane.f32.xlu1 %v177_v30  ;;  %v427_v33 = vpack.c.bf16 %v203_v27, %v202_v20  ;;  %v183_v34 = vsel %vm63_vm1, %v58_v26, 0.0  ;;  %v320_v36 = vsel %vm63_vm1, %v201_v25, 0.0  ;;  %v326_v38 = vsel %vm63_vm1, %v203_v27, 0.0 }
  0x8a   :  { %411 = vmatprep.subr.msk.bf16.mxu0 %vm521_vm2, %v409_v31  ;;  %423 = vmatprep.subr.msk.bf16.mxu1 %vm521_vm2, %v421_v32 }
  0x8b   :  { %414 = vmatpush3.bf16.xpose.msk.msra.mxu0 %vm521_vm2, %v409_v31  ;;  %426 = vmatpush3.bf16.xpose.msk.msra.mxu1 %vm521_vm2, %v421_v32 }
  0x8c   :  { %417 = vmatprep.subr.msk.bf16.mxu0 %vm521_vm2, %v415_v29  ;;  %429 = vmatprep.subr.msk.bf16.mxu1 %vm521_vm2, %v427_v33 }
  0x8d   :  { %184 = vadd.xlane.f32.xlu0 %v183_v34  ;;  %318 = vadd.xlane.f32.xlu1 %v317_v35 }
  0x91   :  { %321 = vadd.xlane.f32.xlu0 %v320_v36  ;;  %324 = vadd.xlane.f32.xlu1 %v323_v37 }
  0x93   :  { %420 = vmatpush3.bf16.xpose.msk.msra.mxu0 %vm521_vm2, %v415_v29  ;;  %432 = vmatpush3.bf16.xpose.msk.msra.mxu1 %vm521_vm2, %v427_v33 }
  0x95   :  { %327 = vadd.xlane.f32.xlu0 %v326_v38 }
  0x9a   :  { %390 = vmatmul.mubr.msk.f32.vlgmr.msra.gmra.mrb[0].mxu0 %vm63_vm1, %v56_v24  ;;  %404 = vmatmul.mubr.msk.f32.vlgmr.msra.gmra.mrb[0].mxu1 %vm63_vm1, %v201_v25 }
  0x9b   :  { %392 = vmatprep.mubr.msk.f32.mxu0 %vm63_vm1, %v57_v14  ;;  %406 = vmatprep.mubr.msk.f32.mxu1 %vm63_vm1, %v202_v20 }
  0x9e   :  { %393 = vmatmul.mubr.msk.f32.gmra.mrb[2].mxu0 %vm63_vm1, %v58_v26  ;;  %407 = vmatmul.mubr.msk.f32.gmra.mrb[2].mxu1 %vm63_vm1, %v203_v27 }
 0x112   :  { %v176_v40 = vpop.xlane.xlu0 %175 }
 0x113   :  { %v186_v41 = vadd.f32 %v176_v40, %v170_v39 }
 0x115   :  { %191 = vst.msk [vmem:[%s686_s3] sm:$0xff] %vm22_vm0, %v186_v41 }
 0x116   :  { %v179_v44 = vpop.xlane.xlu1 %178  ;;  %v182_v45 = vpop.xlane.xlu0 %181 }
 0x117   :  { %v187_v46 = vadd.f32 %v179_v44, %v171_v42  ;;  %v188_v47 = vadd.f32 %v182_v45, %v172_v43 }
 0x119   :  { %192 = vst.msk [vmem:[%s686_s3 + $0x8] sm:$0xff] %vm22_vm0, %v187_v46  ;;  %193 = vst.msk [vmem:[%s686_s3 + $0x10] sm:$0xff] %vm22_vm0, %v188_v47 }
 0x11a   :  { %v319_v49 = vpop.xlane.xlu1 %318  ;;  %v185_v50 = vpop.xlane.xlu0 %184 }
 0x11b   :  { %v189_v51 = vadd.f32 %v185_v50, %v173_v48 }
 0x11c   :  { %v313_v52 = vld [vmem:[%s686_s3] sm:$0xff] }
 0x11d   :  { %v329_v53 = vadd.f32 %v319_v49, %v313_v52  ;;  %194 = vst.msk [vmem:[%s686_s3 + $0x18] sm:$0xff] %vm22_vm0, %v189_v51 }
 0x11e   :  { %v322_v54 = vpop.xlane.xlu0 %321  ;;  %v325_v55 = vpop.xlane.xlu1 %324 }
 0x11f   :  { %333 = vst.msk [vmem:[%s686_s3] sm:$0xff] %vm22_vm0, %v329_v53 }
 0x120   :  { %v315_v56 = vld [vmem:[%s686_s3 + $0x10] sm:$0xff]  ;;  %v314_v57 = vld [vmem:[%s686_s3 + $0x8] sm:$0xff] }
 0x121   :  { %v331_v58 = vadd.f32 %v325_v55, %v315_v56  ;;  %v330_v59 = vadd.f32 %v322_v54, %v314_v57 }
 0x122   :  { %v328_v61 = vpop.xlane.xlu0 %327 }
 0x123   :  { %335 = vst.msk [vmem:[%s686_s3 + $0x10] sm:$0xff] %vm22_vm0, %v331_v58  ;;  %334 = vst.msk [vmem:[%s686_s3 + $0x8] sm:$0xff] %vm22_vm0, %v330_v59 }
 0x124   :  { %v316_v60 = vld [vmem:[%s686_s3 + $0x18] sm:$0xff] }
 0x125   :  { %v332_v62 = vadd.f32 %v328_v61, %v316_v60 }
 0x127   :  { %336 = vst.msk [vmem:[%s686_s3 + $0x18] sm:$0xff] %vm22_vm0, %v332_v62 }
 0x16d   :  { %v391_v1 = vpop.f32.mrb[0].mxu0  ;;  %v405_v3 = vpop.f32.mrb[0].mxu1 }
 0x16e   :  { %v162_v2 = vadd.f32 %v391_v1, %v60_v63  ;;  %v142_v4 = vpop.f32.mrb[1].mxu0  ;;  %v286_v6 = vpop.f32.mrb[1].mxu1 }
 0x16f   :  { %v161_v5 = vadd.f32 %v142_v4, %v59_v0 }
 0x170   :  { %167 = vst.msk [vmem:[%s688_s2 + $0x8] sm:$0xff] %vm17_vm3, %v162_v2 }
 0x171   :  { %166 = vst.msk [vmem:[%s688_s2] sm:$0xff] %vm17_vm3, %v161_v5  ;;  %v394_v9 = vpop.f32.mrb[2].mxu0  ;;  %v408_v11 = vpop.f32.mrb[2].mxu1 }
 0x172   :  { %v164_v10 = vadd.f32 %v394_v9, %v62_v7  ;;  %v152_v12 = vpop.f32.mrb[3].mxu0  ;;  %v296_v14 = vpop.f32.mrb[3].mxu1 }
 0x173   :  { %v163_v13 = vadd.f32 %v152_v12, %v61_v8 }
 0x174   :  { %169 = vst.msk [vmem:[%s688_s2 + $0x18] sm:$0xff] %vm17_vm3, %v164_v10 }
 0x175   :  { %168 = vst.msk [vmem:[%s688_s2 + $0x10] sm:$0xff] %vm17_vm3, %v163_v13 }
 0x177   :  { %v205_v15 = vld [vmem:[%s688_s2 + $0x8] sm:$0xff] }
 0x178   :  { %v306_v16 = vadd.f32 %v405_v3, %v205_v15  ;;  %v204_v17 = vld [vmem:[%s688_s2] sm:$0xff] }
 0x179   :  { %v305_v18 = vadd.f32 %v286_v6, %v204_v17 }
 0x17a   :  { %310 = vst.msk [vmem:[%s688_s2 + $0x8] sm:$0xff] %vm17_vm3, %v306_v16 }
 0x17b   :  { %309 = vst.msk [vmem:[%s688_s2] sm:$0xff] %vm17_vm3, %v305_v18  ;;  %v207_v19 = vld [vmem:[%s688_s2 + $0x18] sm:$0xff] }
 0x17c   :  { %v308_v20 = vadd.f32 %v408_v11, %v207_v19  ;;  %v206_v21 = vld [vmem:[%s688_s2 + $0x10] sm:$0xff] }
 0x17d   :  { %v307_v22 = vadd.f32 %v296_v14, %v206_v21 }
 0x17e   :  { %312 = vst.msk [vmem:[%s688_s2 + $0x18] sm:$0xff] %vm17_vm3, %v308_v20 }
 0x17f   :  { %311 = vst.msk [vmem:[%s688_s2 + $0x10] sm:$0xff] %vm17_vm3, %v307_v22 }

// kernel: zca_norm_pi_v2_clip_train.3
= control target key start
LH: loop header
LB: loop body
LE: loop exit
PB: predicated region body
PF: predicated region fallthrough
CT: control target
= control target key end

     0   :  { %vm46_vm0 = vcmask 261120   ;;  %v327_v3 = vmov 0   ;;  %vm144_vm1 = vcmask 523264   ;;  %s436_s2 = inlined_call_operand.vmem [shape: f32[2,32,64], index: 2, kind: input, shape index: {}]   ;;  %s437_s0 = inlined_call_operand.vmem [shape: f32[32,32], index: 0, kind: input, shape index: {}]   ;;  %s438_s1 = inlined_call_operand.vmem [shape: f32[32,1], index: 1, kind: input, shape index: {}]   ;;  %s439_s3 = inlined_call_operand.vmem [shape: f32[2,32,64], index: 3, kind: output, shape index: {}]  }
   0x1   :  { %v22_v0 = vld [vmem:[%s436_s2] sm:$0xff]  ;;  %v23_v1 = vld [vmem:[%s436_s2 + $0x8] sm:$0xff]  ;;  %325 = vset.pattern.permute.xlu0 %v327_v3  ;;  %326 = vset.pattern.permute.xlu1 %v327_v3  ;;  %v24_v6 = vld [vmem:[%s436_s2 + $0x10] sm:$0xff] }
   0x2   :  { %v252_v2 = vld [vmem:[%s436_s2 + $0x20] sm:$0xff]  ;;  %v308_v4 = vpack.c.bf16 %v23_v1, %v22_v0  ;;  %v253_v5 = vld [vmem:[%s436_s2 + $0x28] sm:$0xff]  ;;  %v25_v7 = vld [vmem:[%s436_s2 + $0x18] sm:$0xff] }
   0x3   :  { %v316_v8 = vpack.c.bf16 %v253_v5, %v252_v2  ;;  %v312_v9 = vpack.c.bf16 %v25_v7, %v24_v6  ;;  %v254_v10 = vld [vmem:[%s436_s2 + $0x30] sm:$0xff]  ;;  %v255_v11 = vld [vmem:[%s436_s2 + $0x38] sm:$0xff]  ;;  %v14_v12 = vld [vmem:[%s437_s0] sm:$0xff] }
   0x4   :  { %309 = vmatprep.subr.bf16.mxu0 %v308_v4  ;;  %v320_v13 = vpack.c.bf16 %v255_v11, %v254_v10  ;;  %288 = vmatprep.mubr.msk.f32.mxu0 %vm46_vm0, %v14_v12  ;;  %v18_v14 = vld [vmem:[%s438_s1] sm:$0xff]  ;;  %v20_v15 = vld [vmem:[%s438_s1 + $0x10] sm:$0xff]  ;;  %v15_v16 = vld [vmem:[%s437_s0 + $0x8] sm:$0xff] }
   0x5   :  { %317 = vmatprep.subr.bf16.mxu1 %v316_v8  ;;  %311 = vmatpush3.bf16.msra.mxu0 %v308_v4  ;;  %v19_v17 = vld [vmem:[%s438_s1 + $0x8] sm:$0xff]  ;;  %v16_v18 = vld [vmem:[%s437_s0 + $0x10] sm:$0xff]  ;;  %v21_v19 = vld [vmem:[%s438_s1 + $0x18] sm:$0xff] }
   0x6   :  { %319 = vmatpush3.bf16.msra.mxu1 %v316_v8  ;;  %313 = vmatprep.subr.bf16.mxu0 %v312_v9  ;;  %v17_v20 = vld [vmem:[%s437_s0 + $0x18] sm:$0xff] }
   0x7   :  { %321 = vmatprep.subr.bf16.mxu1 %v320_v13  ;;  %302 = vmatprep.mubr.msk.f32.mxu1 %vm46_vm0, %v14_v12 }
   0x8   :  { %28 = vperm.xlu0 %325, %v18_v14   ;;  %38 = vperm.xlu1 %326, %v20_v15  }
   0x9   :  { %315 = vmatpush3.bf16.msra.mxu0 %v312_v9 }
   0xa   :  { %323 = vmatpush3.bf16.msra.mxu1 %v320_v13 }
   0xc   :  { %289 = vmatmul.mubr.msk.f32.vlgmr.msra.gmra.mrb[0].mxu0 %vm46_vm0, %v15_v16  ;;  %33 = vperm.xlu0 %325, %v19_v17  }
   0xd   :  { %303 = vmatmul.mubr.msk.f32.vlgmr.msra.gmra.mrb[0].mxu1 %vm46_vm0, %v15_v16  ;;  %291 = vmatprep.mubr.msk.f32.mxu0 %vm46_vm0, %v16_v18 }
   0xe   :  { %305 = vmatprep.mubr.msk.f32.mxu1 %vm46_vm0, %v16_v18  ;;  %43 = vperm.xlu1 %326, %v21_v19  }
  0x10   :  { %292 = vmatmul.mubr.msk.f32.gmra.mrb[2].mxu0 %vm46_vm0, %v17_v20 }
  0x11   :  { %306 = vmatmul.mubr.msk.f32.gmra.mrb[2].mxu1 %vm46_vm0, %v17_v20 }
  0x87   :  { %v29_v21 = vpop.permute.xlu0 %28  ;;  %v39_v22 = vpop.permute.xlu1 %38 }
  0x8b   :  { %v34_v23 = vpop.permute.xlu0 %33 }
  0x8d   :  { %v44_v32 = vpop.permute.xlu1 %43 }
  0xdf   :  { %v290_v24 = vpop.f32.mrb[0].mxu0 }
  0xe0   :  { %v131_v25 = vadd.f32 %v290_v24, %v34_v23  ;;  %v304_v26 = vpop.f32.mrb[0].mxu1  ;;  %v125_v27 = vpop.f32.mrb[1].mxu0 }
  0xe1   :  { %v226_v28 = vadd.f32 %v304_v26, %v34_v23  ;;  %v126_v29 = vadd.f32 %v125_v27, %v29_v21  ;;  %v220_v30 = vpop.f32.mrb[1].mxu1 }
  0xe2   :  { %146 = vst.msk [vmem:[%s439_s3 + $0x8] sm:$0xff] %vm144_vm1, %v131_v25  ;;  %v221_v31 = vadd.f32 %v220_v30, %v29_v21 }
  0xe3   :  { %261 = vst.msk [vmem:[%s439_s3 + $0x28] sm:$0xff] %vm144_vm1, %v226_v28  ;;  %145 = vst.msk [vmem:[%s439_s3] sm:$0xff] %vm144_vm1, %v126_v29  ;;  %v293_v33 = vpop.f32.mrb[2].mxu0 }
  0xe4   :  { %260 = vst.msk [vmem:[%s439_s3 + $0x20] sm:$0xff] %vm144_vm1, %v221_v31  ;;  %v141_v34 = vadd.f32 %v293_v33, %v44_v32  ;;  %v307_v35 = vpop.f32.mrb[2].mxu1  ;;  %v135_v36 = vpop.f32.mrb[3].mxu0 }
  0xe5   :  { %v236_v37 = vadd.f32 %v307_v35, %v44_v32  ;;  %v136_v38 = vadd.f32 %v135_v36, %v39_v22  ;;  %v230_v39 = vpop.f32.mrb[3].mxu1 }
  0xe6   :  { %148 = vst.msk [vmem:[%s439_s3 + $0x18] sm:$0xff] %vm144_vm1, %v141_v34  ;;  %v231_v40 = vadd.f32 %v230_v39, %v39_v22 }
  0xe7   :  { %263 = vst.msk [vmem:[%s439_s3 + $0x38] sm:$0xff] %vm144_vm1, %v236_v37  ;;  %147 = vst.msk [vmem:[%s439_s3 + $0x10] sm:$0xff] %vm144_vm1, %v136_v38 }
  0xe8   :  { %262 = vst.msk [vmem:[%s439_s3 + $0x30] sm:$0xff] %vm144_vm1, %v231_v40 }

</bundles_post_ra>
